<compile_context>
chip_gen: v7x
topology: tpu7x:2x2x1
jax: 0.10.0
libtpu: 0.0.40
codegen_flags: <defaults>
</compile_context>

<pallas_src>
import functools
import math

import jax
import jax.numpy as jnp
from jax import lax
from jax.experimental import pallas as pl
from jax.experimental.pallas import tpu as pltpu


# ---------------------------------------------------------------------------
# Pallas kernels
# ---------------------------------------------------------------------------
def _linear_kernel(x_ref, w_ref, b_ref, o_ref):
    # x: (tm, K) bf16, w: (K, tn) bf16, b: (1, tn) f32 -> o: (tm, tn)
    acc = jnp.dot(x_ref[...], w_ref[...], preferred_element_type=jnp.float32)
    o_ref[...] = (acc + b_ref[...]).astype(o_ref.dtype)


def _flash_attn_kernel(q_ref, k_ref, v_ref, o_ref, m_sc, l_sc, acc_sc):
    # blocks: q (1, tq, hd), k/v (1, tk, hd); grid = (B*H, q_tiles, kv_tiles)
    kv_idx = pl.program_id(2)

    @pl.when(kv_idx == 0)
    def _():
        m_sc[...] = jnp.full_like(m_sc, -jnp.inf)
        l_sc[...] = jnp.zeros_like(l_sc)
        acc_sc[...] = jnp.zeros_like(acc_sc)

    q = q_ref[0]  # (tq, hd) bf16 — softmax scale already folded into Wq
    k = k_ref[0]  # (tk, hd) bf16
    v = v_ref[0]  # (tk, hd) bf16

    # scores = q @ k^T without materializing k.T (contraction over hd).
    s = lax.dot_general(
        q, k,
        dimension_numbers=(((1,), (1,)), ((), ())),
        preferred_element_type=jnp.float32,
    )  # (tq, tk) f32

    m_prev = m_sc[...]                                        # (tq, 1)
    m_new = jnp.maximum(m_prev, jnp.max(s, axis=-1, keepdims=True))
    alpha = jnp.exp(m_prev - m_new)
    p = jnp.exp(s - m_new)                                    # (tq, tk) f32
    l_sc[...] = alpha * l_sc[...] + jnp.sum(p, axis=-1, keepdims=True)
    acc_sc[...] = alpha * acc_sc[...] + jnp.dot(
        p.astype(v.dtype), v, preferred_element_type=jnp.float32
    )
    m_sc[...] = m_new

    @pl.when(kv_idx == pl.num_programs(2) - 1)
    def _():
        inv_l = pl.reciprocal(l_sc[...], approx=True)         # EUP, ~free
        o_ref[0] = (acc_sc[...] * inv_l).astype(o_ref.dtype)


# ---------------------------------------------------------------------------
# Wrappers
# ---------------------------------------------------------------------------
def _round_up(x, m):
    return ((x + m - 1) // m) * m


def pallas_linear(x, w_t, b_row, *, out_dtype=jnp.float32,
                  tile_m=256, tile_n=256):
    """y = x @ w_t + b_row, tiled over (M, N) with full K per grid step.

    x: (M, K); w_t: (K, N); b_row: (1, N).  Operands are cast to bf16 for the
    MXU; accumulation is f32.  M/N are zero-padded up to tile multiples when
    they exceed the tile, and the result is sliced back.
    """
    m, kdim = x.shape
    _, n = w_t.shape

    x = x.astype(jnp.bfloat16)
    w_t = w_t.astype(jnp.bfloat16)
    b_row = b_row.astype(jnp.float32)

    if m <= tile_m:
        tm, m_pad = m, m
    else:
        tm = tile_m
        m_pad = _round_up(m, tm)
        if m_pad != m:
            x = jnp.pad(x, ((0, m_pad - m), (0, 0)))
    if n <= tile_n:
        tn, n_pad = n, n
    else:
        tn = tile_n                      # multiple of 128 -> lane-dense stores
        n_pad = _round_up(n, tn)
        if n_pad != n:
            w_t = jnp.pad(w_t, ((0, 0), (0, n_pad - n)))
            b_row = jnp.pad(b_row, ((0, 0), (0, n_pad - n)))
    # TODO(synk): add a K grid axis (with an f32 VMEM accumulator) for very
    # large d_model where a full-K weight column tile would not fit VMEM.

    grid = (m_pad // tm, n_pad // tn)
    cost = pl.CostEstimate(
        flops=2 * m_pad * kdim * n_pad,
        transcendentals=0,
        bytes_accessed=(x.size * x.dtype.itemsize
                        + w_t.size * w_t.dtype.itemsize
                        + b_row.size * 4
                        + m_pad * n_pad * jnp.dtype(out_dtype).itemsize),
    )
    out = pl.pallas_call(
        _linear_kernel,
        out_shape=jax.ShapeDtypeStruct((m_pad, n_pad), out_dtype),
        grid=grid,
        in_specs=[
            pl.BlockSpec((tm, kdim), lambda i, j: (i, 0)),
            pl.BlockSpec((kdim, tn), lambda i, j: (0, j)),
            pl.BlockSpec((1, tn), lambda i, j: (0, j)),
        ],
        out_specs=pl.BlockSpec((tm, tn), lambda i, j: (i, j)),
        compiler_params=pltpu.CompilerParams(
            dimension_semantics=("parallel", "parallel")
        ),
        cost_estimate=cost,
    )(x, w_t, b_row)
    if (m_pad, n_pad) != (m, n):
        out = out[:m, :n]
    return out


def pallas_flash_attention(q, k, v, *, tile_q=128, tile_kv=128):
    """q/k/v: (B*H, S, hd) bf16 -> (B*H, S, hd) bf16, flash-style softmax."""
    bh, s, hd = q.shape
    tq = min(tile_q, s)
    tk = min(tile_kv, s)
    # TODO(synk): sequence lengths not divisible by the tile need KV masking.
    assert s % tq == 0 and s % tk == 0, "seq must divide the attention tiles"

    grid = (bh, s // tq, s // tk)
    cost = pl.CostEstimate(
        flops=4 * bh * s * s * hd,
        transcendentals=bh * s * s,
        bytes_accessed=4 * bh * s * hd * 2,
    )
    return pl.pallas_call(
        _flash_attn_kernel,
        out_shape=jax.ShapeDtypeStruct((bh, s, hd), jnp.bfloat16),
        grid=grid,
        in_specs=[
            pl.BlockSpec((1, tq, hd), lambda b, qi, ki: (b, qi, 0)),
            pl.BlockSpec((1, tk, hd), lambda b, qi, ki: (b, ki, 0)),
            pl.BlockSpec((1, tk, hd), lambda b, qi, ki: (b, ki, 0)),
        ],
        out_specs=pl.BlockSpec((1, tq, hd), lambda b, qi, ki: (b, qi, 0)),
        scratch_shapes=[
            pltpu.VMEM((tq, 1), jnp.float32),   # running max
            pltpu.VMEM((tq, 1), jnp.float32),   # running denom
            pltpu.VMEM((tq, hd), jnp.float32),  # output accumulator
        ],
        compiler_params=pltpu.CompilerParams(
            dimension_semantics=("parallel", "parallel", "arbitrary")
        ),
        cost_estimate=cost,
    )(q, k, v)


class MultiHeadAttentionPallas:
    def __init__(self, d_model, num_heads, key):
        self.d_model = d_model
        self.num_heads = num_heads
        self.head_dim = d_model // num_heads
        keys = jax.random.split(key, 8)
        bound = 1.0 / math.sqrt(d_model)

        def init_linear(kw, kb):
            w = jax.random.uniform(
                kw, (d_model, d_model), jnp.float32, -bound, bound
            )
            b = jax.random.uniform(kb, (d_model,), jnp.float32, -bound, bound)
            return w, b

        # PyTorch layout (out_features, in_features), f32 masters.
        self.wq, self.bq = init_linear(keys[0], keys[1])
        self.wk, self.bk = init_linear(keys[2], keys[3])
        self.wv, self.bv = init_linear(keys[4], keys[5])
        self.wo, self.bo = init_linear(keys[6], keys[7])

        # Kernel-side parameters: transposed to (in, out), bf16, with the
        # softmax scale folded into the Q projection (weights AND bias).
        scale = 1.0 / math.sqrt(self.head_dim)
        self.wq_t = (self.wq * scale).T.astype(jnp.bfloat16)
        self.wk_t = self.wk.T.astype(jnp.bfloat16)
        self.wv_t = self.wv.T.astype(jnp.bfloat16)
        self.wo_t = self.wo.T.astype(jnp.bfloat16)
        self.bq_row = (self.bq * scale).reshape(1, d_model)
        self.bk_row = self.bk.reshape(1, d_model)
        self.bv_row = self.bv.reshape(1, d_model)
        self.bo_row = self.bo.reshape(1, d_model)
        # Fused QKV parameters (self-attention fast path): (D, 3D) / (1, 3D).
        self.w_qkv_t = jnp.concatenate(
            [self.wq_t, self.wk_t, self.wv_t], axis=1
        )
        self.b_qkv = jnp.concatenate(
            [self.bq_row, self.bk_row, self.bv_row], axis=1
        )

    def __call__(self, query, key, value):
        # TODO(synk): optional `mask` argument not implemented (forward default
        # is mask=None); masked_fill path omitted.
        b, s, d = query.shape
        h, hd = self.num_heads, self.head_dim

        if query is key and key is value:
            # Self-attention: one fused projection, x read from HBM once.
            qkv = pallas_linear(
                query.reshape(b * s, d), self.w_qkv_t, self.b_qkv,
                out_dtype=jnp.bfloat16,
            )
            q2d = qkv[:, :d]
            k2d = qkv[:, d:2 * d]
            v2d = qkv[:, 2 * d:]
        else:
            q2d = pallas_linear(query.reshape(b * s, d), self.wq_t,
                                self.bq_row, out_dtype=jnp.bfloat16)
            k2d = pallas_linear(key.reshape(b * s, d), self.wk_t,
                                self.bk_row, out_dtype=jnp.bfloat16)
            v2d = pallas_linear(value.reshape(b * s, d), self.wv_t,
                                self.bv_row, out_dtype=jnp.bfloat16)

        # split heads: (B, S, H, hd) -> (B, H, S, hd) -> (B*H, S, hd)
        # TODO(synk): for head_dim >= 128 these transposes could be folded into
        # the attention BlockSpecs (lane-dense head slices) to save HBM passes.
        def split_heads(x2d):
            return (
                x2d.reshape(b, s, h, hd)
                .transpose(0, 2, 1, 3)
                .reshape(b * h, s, hd)
            )

        qh, kh, vh = split_heads(q2d), split_heads(k2d), split_heads(v2d)

        out = pallas_flash_attention(qh, kh, vh)        # (B*H, S, hd) bf16

        # merge heads: (B, H, S, hd) -> (B, S, H*hd)
        out2d = (
            out.reshape(b, h, s, hd)
            .transpose(0, 2, 1, 3)
            .reshape(b * s, d)
        )
        out2d = pallas_linear(out2d, self.wo_t, self.bo_row,
                              out_dtype=jnp.float32)
        return out2d.reshape(b, s, d)


# ---------------------------------------------------------------------------
# Pure-JAX f32 reference (for correctness check)
# ---------------------------------------------------------------------------
def reference_mha(mha, query, key, value):
    b, s, d = query.shape
    h, hd = mha.num_heads, mha.head_dim
    q = query @ mha.wq.T + mha.bq
    k = key @ mha.wk.T + mha.bk
    v = value @ mha.wv.T + mha.bv
    q = q.reshape(b, s, h, hd).transpose(0, 2, 1, 3)
    k = k.reshape(b, s, h, hd).transpose(0, 2, 1, 3)
    v = v.reshape(b, s, h, hd).transpose(0, 2, 1, 3)
    scores = jnp.einsum("bhqd,bhkd->bhqk", q, k) / math.sqrt(hd)
    attn = jax.nn.softmax(scores, axis=-1)
    out = jnp.einsum("bhqk,bhkd->bhqd", attn, v)
    out = out.transpose(0, 2, 1, 3).reshape(b, s, d)
    return out @ mha.wo.T + mha.bo


if __name__ == "__main__":
    batch, seq, d_model, num_heads = 2, 8, 32, 4
    root = jax.random.PRNGKey(0)
    k_param, k_q, k_k, k_v = jax.random.split(root, 4)

    mha = MultiHeadAttentionPallas(d_model, num_heads, k_param)

    query = jax.random.normal(k_q, (batch, seq, d_model), jnp.float32)
    key = jax.random.normal(k_k, (batch, seq, d_model), jnp.float32)
    value = jax.random.normal(k_v, (batch, seq, d_model), jnp.float32)

    # Generic (cross-attention) path: distinct q/k/v inputs.
    out = jax.block_until_ready(mha(query, key, value))
    ref = reference_mha(mha, query, key, value)
    assert out.shape == (batch, seq, d_model)
    assert jnp.allclose(out, ref, atol=5e-2, rtol=5e-2), "cross-attn mismatch"

    # Fused-QKV (self-attention) path: same tensor for q/k/v.
    out_self = jax.block_until_ready(mha(query, query, query))
    ref_self = reference_mha(mha, query, query, query)
    assert jnp.allclose(out_self, ref_self, atol=5e-2, rtol=5e-2), \
        "self-attn mismatch"

    print("KERNEL_OK")
</pallas_src>

<mosaic_0001>
module attributes {stable_mosaic.version = 11 : i64} {
  func.func @_linear_kernel(%arg0: i32, %arg1: i32, %arg2: memref<16x32xbf16, #tpu.memory_space<vmem>>, %arg3: memref<32x32xbf16, #tpu.memory_space<vmem>>, %arg4: memref<1x32xf32, #tpu.memory_space<vmem>>, %arg5: memref<16x32xbf16, #tpu.memory_space<vmem>>) attributes {dimension_semantics = [#tpu.dimension_semantics<parallel>, #tpu.dimension_semantics<parallel>], iteration_bounds = array<i64: 1, 1>, scalar_prefetch = 0 : i64, scratch_operands = 0 : i64, tpu.core_type = #tpu.core_type<tc>, window_params = [{transform_indices = @transform_0, window_bounds = array<i64: 16, 32>}, {transform_indices = @transform_1, window_bounds = array<i64: 32, 32>}, {transform_indices = @transform_2, window_bounds = array<i64: 1, 32>}, {transform_indices = @transform_3, window_bounds = array<i64: 16, 32>}]} {
    %c0 = arith.constant 0 : index
    %c0_0 = arith.constant 0 : index
    %0 = vector.load %arg2[%c0, %c0_0] : memref<16x32xbf16, #tpu.memory_space<vmem>>, vector<16x32xbf16>
    %c0_1 = arith.constant 0 : index
    %c0_2 = arith.constant 0 : index
    %1 = vector.load %arg3[%c0_1, %c0_2] : memref<32x32xbf16, #tpu.memory_space<vmem>>, vector<32x32xbf16>
    %cst = arith.constant dense<0.000000e+00> : vector<16x32xf32>
    %2 = tpu.matmul %0, %1, %cst {dimension_numbers = #tpu.dot_dimension_numbers<[1], [0], [0], [1], [0, 0, 1, 1], [], []>} : vector<16x32xbf16>, vector<32x32xbf16>, vector<16x32xf32> -> vector<16x32xf32>
    %c0_3 = arith.constant 0 : index
    %c0_4 = arith.constant 0 : index
    %3 = vector.load %arg4[%c0_3, %c0_4] : memref<1x32xf32, #tpu.memory_space<vmem>>, vector<1x32xf32>
    %4 = vector.broadcast %3 : vector<1x32xf32> to vector<16x32xf32>
    %5 = arith.addf %2, %4 : vector<16x32xf32>
    %6 = arith.truncf %5 : vector<16x32xf32> to vector<16x32xbf16>
    %c0_5 = arith.constant 0 : index
    %c0_6 = arith.constant 0 : index
    %7 = vector.load %arg5[%c0_5, %c0_6] : memref<16x32xbf16, #tpu.memory_space<vmem>>, vector<16x32xbf16>
    tpu.vector_store %arg5[%c0_5, %c0_6], %6 {strides = array<i32>} : memref<16x32xbf16, #tpu.memory_space<vmem>>, vector<16x32xbf16>,
    return
  }
  func.func @transform_0(%arg0: i32, %arg1: i32) -> (i32, i32) {
    %c0_i32 = arith.constant 0 : i32
    %c0_i32_0 = arith.constant 0 : i32
    return %arg0, %c0_i32 : i32, i32
  }
  func.func @transform_1(%arg0: i32, %arg1: i32) -> (i32, i32) {
    %c0_i32 = arith.constant 0 : i32
    %c0_i32_0 = arith.constant 0 : i32
    return %c0_i32, %arg1 : i32, i32
  }
  func.func @transform_2(%arg0: i32, %arg1: i32) -> (i32, i32) {
    %c0_i32 = arith.constant 0 : i32
    %c0_i32_0 = arith.constant 0 : i32
    return %c0_i32, %arg1 : i32, i32
  }
  func.func @transform_3(%arg0: i32, %arg1: i32) -> (i32, i32) {
    %c0_i32 = arith.constant 0 : i32
    return %arg0, %arg1 : i32, i32
  }
}

</mosaic_0001>

<bundles_post_ra>
// kernel: tpu_custom_call.1
= control target key start
LH: loop header
LB: loop body
LE: loop exit
PB: predicated region body
PF: predicated region fallthrough
CT: control target
= control target key end

     0   :  { %8 = vsyncpa [#allocation3], 0  ;;  %s325_s0 = inlined_call_operand.hbm [shape: bf16[16,32], index: 0, kind: input, shape index: {}]   ;;  %s326_s1 = inlined_call_operand.hbm [shape: bf16[32,32], index: 1, kind: input, shape index: {}]   ;;  %s327_s2 = inlined_call_operand.vmem [shape: f32[1,32], index: 2, kind: input, shape index: {}]   ;;  %s328_s3 = inlined_call_operand.hbm [shape: bf16[16,32], index: 3, kind: output, shape index: {}]  }
   0x1   :  { %9 = vsyncpa [#allocation6], 0 }
   0x2   :  { %10 = vsyncpa [#allocation4], 0  ;;  %s250_s12 = smov [#allocation2]   ;;  %s178_s16 = scalar_lea.hbm %s325_s0, 128 }
   0x3   :  { %s16_s13 = sshll.u32 %s250_s12, 4  ;;  %p179_p0 = scmp.ne.s32.totalorder %s325_s0, %s178_s16  ;;  %s17_s13 = int_to_ptr.vmem [resolvable:$true] %s16_s13 }
   0x4   :  { %p182_p1 = scmp.lt.u32.totalorder %s178_s16, %s325_s0 }
   0x6   :  { %p184_p2 = pnand %p182_p1, %p179_p0 }
   0x8   :  { %187 = shalt.err (!%p184_p2)
}
   0x9   :  { %s188_s21 = scalar_lea.vmem %s17_s13, 128  ;;  %p193_p4 = scmp.lt.s32.totalorder %s17_s13, %s17_s13 }
   0xa   :  { %p189_p3 = scmp.ne.s32.totalorder %s17_s13, %s188_s21  ;;  %p194_p5 = scmp.lt.s32.totalorder %s188_s21, %s188_s21 }
   0xc   :  { %p195_p6 = por %p194_p5, %p193_p4 }
   0xe   :  { %p196_p7 = pnand %p195_p6, %p189_p3 }
  0x10   :  { %199 = shalt.err (!%p196_p7)
}
  0x11   :  { %s251_s22 = smov 64   ;;  %s252_s23 = smov 4  }
  0x12   :  { %22 = dma.hbm_to_vmem [thread:$0]  %s325_s0, 128, %s17_s13, [#allocation3], %s251_s22, %s251_s22, %s252_s23  }
  0x13   :  { %s253_s26 = smov [#allocation5]   ;;  %s200_s30 = scalar_lea.hbm %s326_s1, 256 }
  0x14   :  { %s28_s27 = sshll.u32 %s253_s26, 4  ;;  %p201_p8 = scmp.ne.s32.totalorder %s326_s1, %s200_s30  ;;  %s29_s27 = int_to_ptr.vmem [resolvable:$true] %s28_s27 }
  0x15   :  { %p204_p9 = scmp.lt.u32.totalorder %s200_s30, %s326_s1 }
  0x17   :  { %p206_p10 = pnand %p204_p9, %p201_p8 }
  0x19   :  { %209 = shalt.err (!%p206_p10)
}
  0x1a   :  { %s210_s8 = scalar_lea.vmem %s29_s27, 256  ;;  %p215_p12 = scmp.lt.s32.totalorder %s29_s27, %s29_s27 }
  0x1b   :  { %p211_p11 = scmp.ne.s32.totalorder %s29_s27, %s210_s8  ;;  %p216_p13 = scmp.lt.s32.totalorder %s210_s8, %s210_s8 }
  0x1d   :  { %p217_p0 = por %p216_p13, %p215_p12 }
  0x1f   :  { %p218_p1 = pnand %p217_p0, %p211_p11 }
  0x21   :  { %221 = shalt.err (!%p218_p1)
}
  0x22   :  { %34 = dma.hbm_to_vmem [thread:$0]  %s326_s1, 256, %s29_s27, [#allocation6], %s251_s22, %s251_s22, %s252_s23  }
  0x23   :  { %244 = dma.done.wait [#allocation3], 128  }
  0x24   :  { %245 = vsyncadd [#allocation3], 4294967168 }
  0x25   :  { %246 = dma.done.wait [#allocation6], 256  }
  0x26   :  { %247 = vsyncadd [#allocation6], 4294967040  ;;  %v254_v0 = vmov 0.0   ;;  %vm255_vm0 = vmmov 0   ;;  %v175_v1 = vld [vmem:[#allocation5] sm:$0xff]   ;;  %v176_v2 = vld [vmem:[#allocation5 + $0x8] sm:$0xff]  }
  0x27   :  { %160 = vmatprep.subr.bf16.mxu0 %v254_v0  ;;  %164 = vmatprep.mubr.msk.bf16.mxu0 %vm255_vm0, %v254_v0  ;;  %v177_v3 = vld [vmem:[#allocation2] sm:$0xff]   ;;  %vm74_vm1 = vcmask 261120   ;;  %vm127_vm2 = vcmask 257024   ;;  %s256_s1 = smov [#allocation7]  }
  0x28   :  { %161 = vmatpush3.bf16.msra.mxu0 %v175_v1  ;;  %v148_v4 = vld [vmem:[%s327_s2] ss:$0 sm:$0xff]  ;;  %s135_s12 = sshll.u32 %s256_s1, 4  ;;  %s136_s12 = int_to_ptr.vmem [resolvable:$true] %s135_s12 }
  0x29   :  { %162 = vmatprep.subr.bf16.mxu0 %v254_v0  ;;  %s222_s13 = scalar_lea.vmem %s136_s12, 128  ;;  %p227_p3 = scmp.lt.s32.totalorder %s136_s12, %s136_s12 }
  0x2a   :  { %p223_p2 = scmp.ne.s32.totalorder %s136_s12, %s222_s13  ;;  %p228_p4 = scmp.lt.s32.totalorder %s222_s13, %s222_s13 }
  0x2c   :  { %163 = vmatpush3.bf16.msra.mxu0 %v176_v2  ;;  %p229_p5 = por %p228_p4, %p227_p3 }
  0x2e   :  { %p230_p6 = pnand %p229_p5, %p223_p2 }
  0x2f   :  { %165 = vmatmul.mubr.msk.bf16.vlgmr.msra.gmra.mrb[0].mxu0 %vm74_vm1, %v177_v3 }
 0x102   :  { %v112_v5 = vpop.f32.mrb[0].mxu0 }
 0x103   :  { %v113_v6 = vadd.f32 %v148_v4, %v112_v5  ;;  %v166_v7 = vpop.f32.mrb[1].mxu0 }
 0x104   :  { %v115_v8 = vpop.f32.mrb[2].mxu0 }
 0x105   :  { %v155_v9 = vpack.c.bf16 %v113_v6, %v113_v6  ;;  %v116_v10 = vadd.f32 %v148_v4, %v115_v8  ;;  %v167_v11 = vpop.f32.mrb[3].mxu0 }
 0x107   :  { %v156_v12 = vpack.c.bf16 %v116_v10, %v116_v10  ;;  %128 = vst.msk [vmem:[#allocation7] sm:$0xf] %vm127_vm2, %v155_v9 }
 0x109   :  { %129 = vst.msk [vmem:[#allocation7 + $0x4] sm:$0xf] %vm127_vm2, %v156_v12 }
 0x10a   :  { %233 = shalt.err (!%p230_p6)
}
 0x10b   :  { %s234_s15 = scalar_lea.hbm %s328_s3, 128 }
 0x10c   :  { %p235_p7 = scmp.ne.s32.totalorder %s328_s3, %s234_s15  ;;  %p238_p8 = scmp.lt.u32.totalorder %s234_s15, %s328_s3 }
 0x10e   :  { %p240_p9 = pnand %p238_p8, %p235_p7 }
 0x110   :  { %243 = shalt.err (!%p240_p9)
}
 0x111   :  { %141 = dma.vmem_to_hbm [thread:$0]  %s136_s12, 128, %s328_s3, [#allocation4], %s251_s22, %s251_s22, %s252_s23  }
 0x112   :  { %248 = dma.done.wait [#allocation4], 128  }
 0x113   :  { %249 = vsyncadd [#allocation4], 4294967168 }
 0x114   :  { %145 = vsyncpa [#allocation3], 1 }
 0x115   :  { %146 = vsyncpa [#allocation6], 1 }
 0x116   :  { %147 = vsyncpa [#allocation4], 1 }

</bundles_post_ra>
